<compile_context>
chip_gen: v7x
topology: tpu7x:2x2x1
jax: 0.10.0
libtpu: 0.0.40
codegen_flags: <defaults>
</compile_context>

<pallas_src>
import functools
import math

import jax
import jax.numpy as jnp
from jax import lax
from jax.experimental import pallas as pl
from jax.experimental.pallas import tpu as pltpu

_LANES = 128
_N_OUTER = 2  # leading "parallel" grid axis: lets v7x's two TensorCores split the rows


def _smooth_l1_kernel(o_ref, t_ref, out_ref, *, wx, wy, beta, half_over_beta,
                      half_beta, valid_rows):
    # o_ref / t_ref : (tile_rows, 128) blocks of the flattened interleaved data.
    # out_ref       : (8, 128) f32 partial-sum accumulator, resident across the
    #                 inner ("arbitrary") grid axis for this outer block.
    o = pl.program_id(0)
    i = pl.program_id(1)
    n_inner = pl.num_programs(1)
    tile_rows = o_ref.shape[0]

    @pl.when(i == 0)
    def _init():
        out_ref[...] = jnp.zeros_like(out_ref)

    d = o_ref[...].astype(jnp.float32) - t_ref[...].astype(jnp.float32)
    ad = jnp.abs(d)
    elem = jnp.where(ad < beta, (half_over_beta * d) * d, ad - half_beta)

    # Lane parity == channel: even lanes are x (weight wx), odd lanes are y (wy).
    # Built as a single (1, 128) row and broadcast — not a full-tile iota.
    lane = lax.broadcasted_iota(jnp.int32, (1, _LANES), 1)
    w = jnp.where((lane & 1) == 0, wx, wy)
    wl = elem * w

    # Logical first row of this step (independent of the clamped DMA index, so
    # duplicated/ragged tail blocks are masked to zero and never double-counted).
    block_start = (o * n_inner + i) * tile_rows

    def _accumulate(x):
        # (tile_rows, 128) -> (tile_rows//8, 8, 128) is layout-free; the axis-0
        # sum is pure vreg-to-vreg VPU adds (no per-step full XLU reduction).
        out_ref[...] += jnp.sum(x.reshape(tile_rows // 8, 8, _LANES), axis=0)

    fully_valid = block_start + tile_rows <= valid_rows

    @pl.when(fully_valid)
    def _fast():
        _accumulate(wl)

    @pl.when(jnp.logical_not(fully_valid))
    def _boundary():
        row = lax.broadcasted_iota(jnp.int32, (tile_rows, 1), 0) + block_start
        _accumulate(jnp.where(row < valid_rows, wl, 0.0))


def custom_smooth_l1_loss(output, target, weight_x=2.0, weight_y=1.0, beta=1.0,
                          tile_rows=4096):
    """Pallas equivalent of CustomSmoothL1Loss.forward (beta=1.0, mean reduction).

    tile_rows defaults to 4096 (2 MiB per input block, 8 MiB double-buffered):
    good for v5e/v6e/v7x default scoped-VMEM limits.  Larger values (e.g. 8192
    on v6e/v7x) amortize per-step overhead further if VMEM allows.
    """
    assert output.shape == target.shape
    assert output.shape[-1] == 2, "expects trailing (x, y) channel of size 2"

    n_per_channel = math.prod(output.shape[:-1])
    total = n_per_channel * 2

    # Flat lane-dense view (reshape of contiguous data is free).  Only pad to a
    # multiple of 128 lanes when needed (<= 127 zero elements); the zero diff
    # contributes nothing to the weighted sum, so no lane mask is required.
    o_flat = jnp.ravel(output)
    t_flat = jnp.ravel(target)
    lane_total = -(-total // _LANES) * _LANES
    if lane_total != total:
        pad = lane_total - total
        o_flat = jnp.pad(o_flat, (0, pad))
        t_flat = jnp.pad(t_flat, (0, pad))
    rows = lane_total // _LANES
    o2 = o_flat.reshape(rows, _LANES)
    t2 = t_flat.reshape(rows, _LANES)

    # Dtype-aware sublane rounding (f32: 8, bf16: 16, int8/fp8: 32).
    sub = max({4: 8, 2: 16, 1: 32}.get(jnp.dtype(output.dtype).itemsize, 8),
              {4: 8, 2: 16, 1: 32}.get(jnp.dtype(target.dtype).itemsize, 8))
    req = max(int(tile_rows), sub) // sub * sub
    rows_rounded = -(-rows // sub) * sub
    tile_rows_eff = max(sub, min(req, rows_rounded))

    n_blocks = pl.cdiv(rows, tile_rows_eff)
    n_inner = pl.cdiv(n_blocks, _N_OUTER)
    grid = (_N_OUTER, n_inner)

    # Input index map: clamp so the DMA never walks past the array; the kernel
    # masks by the *logical* row index, so clamped duplicate blocks sum to zero.
    def in_map(o, i, _n_inner=n_inner, _last=n_blocks - 1):
        return (jnp.minimum(o * _n_inner + i, _last), 0)

    kernel = functools.partial(
        _smooth_l1_kernel,
        wx=float(weight_x),
        wy=float(weight_y),
        beta=float(beta),
        half_over_beta=0.5 / float(beta),
        half_beta=0.5 * float(beta),
        valid_rows=rows,
    )

    partials = pl.pallas_call(
        kernel,
        out_shape=jax.ShapeDtypeStruct((_N_OUTER * 8, _LANES), jnp.float32),
        grid=grid,
        in_specs=[
            pl.BlockSpec((tile_rows_eff, _LANES), in_map),
            pl.BlockSpec((tile_rows_eff, _LANES), in_map),
        ],
        out_specs=pl.BlockSpec((8, _LANES), lambda o, i: (o, 0)),
        compiler_params=pltpu.CompilerParams(
            dimension_semantics=("parallel", "arbitrary"),
        ),
    )(o2, t2)

    # Tiny final reduction (2*8*128 floats) + mean divisor in the wrapper.
    return jnp.sum(partials) * (1.0 / float(n_per_channel))


def _reference(output, target, weight_x=2.0, weight_y=1.0):
    def sl1(a, b):
        d = a.astype(jnp.float32) - b.astype(jnp.float32)
        ad = jnp.abs(d)
        return jnp.mean(jnp.where(ad < 1.0, 0.5 * d * d, ad - 0.5))

    return sl1(output[..., 0], target[..., 0]) * weight_x + sl1(
        output[..., 1], target[..., 1]) * weight_y


if __name__ == "__main__":
    key = jax.random.PRNGKey(0)
    k1, k2, k3, k4, k5, k6 = jax.random.split(key, 6)

    # Primary test: batch of 2 trajectories, 8 waypoints, (x, y) coords.
    # total = 32 elements -> exercises the lane-alignment + row-mask path.
    B, N = 2, 8
    output = jax.random.normal(k1, (B, N, 2), dtype=jnp.float32) * 2.0
    target = jax.random.normal(k2, (B, N, 2), dtype=jnp.float32) * 2.0
    loss = jax.block_until_ready(custom_smooth_l1_loss(output, target))
    ref = jax.block_until_ready(_reference(output, target))
    assert jnp.allclose(loss, ref, rtol=1e-5, atol=1e-5), (loss, ref)

    # Multi-block test (small tile so both outer blocks do real work, no padding).
    B2, N2 = 16, 64
    output2 = jax.random.normal(k3, (B2, N2, 2), dtype=jnp.float32) * 3.0
    target2 = jax.random.normal(k4, (B2, N2, 2), dtype=jnp.float32) * 3.0
    loss2 = jax.block_until_ready(
        custom_smooth_l1_loss(output2, target2, tile_rows=8))
    ref2 = jax.block_until_ready(_reference(output2, target2))
    assert jnp.allclose(loss2, ref2, rtol=1e-5, atol=1e-5), (loss2, ref2)

    # Ragged test: rows = 20, tile_rows = 8 -> odd block count, a ragged last
    # block and a clamped (fully masked) trailing block on the second outer.
    B3, N3 = 10, 128
    output3 = jax.random.normal(k5, (B3, N3, 2), dtype=jnp.float32) * 3.0
    target3 = jax.random.normal(k6, (B3, N3, 2), dtype=jnp.float32) * 3.0
    loss3 = jax.block_until_ready(
        custom_smooth_l1_loss(output3, target3, tile_rows=8))
    ref3 = jax.block_until_ready(_reference(output3, target3))
    assert jnp.allclose(loss3, ref3, rtol=1e-5, atol=1e-5), (loss3, ref3)

    print("KERNEL_OK")
</pallas_src>

<mosaic_0001>
module attributes {stable_mosaic.version = 11 : i64} {
  func.func @_smooth_l1_kernel(%arg0: i32, %arg1: i32, %arg2: memref<8x128xf32, #tpu.memory_space<vmem>>, %arg3: memref<8x128xf32, #tpu.memory_space<vmem>>, %arg4: memref<8x128xf32, #tpu.memory_space<vmem>>) attributes {dimension_semantics = [#tpu.dimension_semantics<parallel>, #tpu.dimension_semantics<arbitrary>], iteration_bounds = array<i64: 2, 1>, scalar_prefetch = 0 : i64, scratch_operands = 0 : i64, tpu.core_type = #tpu.core_type<tc>, window_params = [{transform_indices = @transform_0, window_bounds = array<i64: 8, 128>}, {transform_indices = @transform_1, window_bounds = array<i64: 8, 128>}, {transform_indices = @transform_2, window_bounds = array<i64: 8, 128>}]} {
    %c0_i32 = arith.constant 0 : i32
    %0 = arith.cmpi eq, %arg1, %c0_i32 : i32
    %1 = arith.extui %0 : i1 to i32
    %c0_i32_0 = arith.constant 0 : i32
    %2 = arith.cmpi ne, %1, %c0_i32_0 : i32
    scf.if %2 {
      %cst_14 = arith.constant 0.000000e+00 : f32
      %35 = vector.broadcast %cst_14 : f32 to vector<8x128xf32>
      %c0_15 = arith.constant 0 : index
      %c0_16 = arith.constant 0 : index
      %36 = vector.load %arg4[%c0_15, %c0_16] : memref<8x128xf32, #tpu.memory_space<vmem>>, vector<8x128xf32>
      tpu.vector_store %arg4[%c0_15, %c0_16], %35 {strides = array<i32>} : memref<8x128xf32, #tpu.memory_space<vmem>>, vector<8x128xf32>,
    } else {
    }
    %c0 = arith.constant 0 : index
    %c0_1 = arith.constant 0 : index
    %3 = vector.load %arg2[%c0, %c0_1] : memref<8x128xf32, #tpu.memory_space<vmem>>, vector<8x128xf32>
    %c0_2 = arith.constant 0 : index
    %c0_3 = arith.constant 0 : index
    %4 = vector.load %arg3[%c0_2, %c0_3] : memref<8x128xf32, #tpu.memory_space<vmem>>, vector<8x128xf32>
    %5 = arith.subf %3, %4 : vector<8x128xf32>
    %6 = math.absf %5 : vector<8x128xf32>
    %cst = arith.constant 1.000000e+00 : f32
    %7 = vector.broadcast %cst : f32 to vector<8x128xf32>
    %8 = arith.cmpf olt, %6, %7 : vector<8x128xf32>
    %cst_4 = arith.constant 5.000000e-01 : f32
    %9 = vector.broadcast %cst_4 : f32 to vector<8x128xf32>
    %10 = arith.mulf %9, %5 : vector<8x128xf32>
    %11 = arith.mulf %10, %5 : vector<8x128xf32>
    %cst_5 = arith.constant 5.000000e-01 : f32
    %12 = vector.broadcast %cst_5 : f32 to vector<8x128xf32>
    %13 = arith.subf %6, %12 : vector<8x128xf32>
    %14 = arith.select %8, %11, %13 : vector<8x128xi1>, vector<8x128xf32>
    %15 = tpu.iota {dimensions = array<i32: 1>} : vector<1x128xi32>
    %c1_i32 = arith.constant 1 : i32
    %16 = vector.broadcast %c1_i32 : i32 to vector<1x128xi32>
    %17 = arith.andi %15, %16 : vector<1x128xi32>
    %c0_i32_6 = arith.constant 0 : i32
    %18 = vector.broadcast %c0_i32_6 : i32 to vector<1x128xi32>
    %19 = arith.cmpi eq, %17, %18 : vector<1x128xi32>
    %cst_7 = arith.constant 2.000000e+00 : f32
    %cst_8 = arith.constant 1.000000e+00 : f32
    %20 = vector.broadcast %cst_7 : f32 to vector<1x128xf32>
    %21 = vector.broadcast %cst_8 : f32 to vector<1x128xf32>
    %22 = arith.select %19, %20, %21 : vector<1x128xi1>, vector<1x128xf32>
    %23 = vector.broadcast %22 : vector<1x128xf32> to vector<8x128xf32>
    %24 = arith.mulf %14, %23 : vector<8x128xf32>
    %c1_i32_9 = arith.constant 1 : i32
    %25 = arith.muli %arg0, %c1_i32_9 : i32
    %26 = arith.addi %25, %arg1 : i32
    %c8_i32 = arith.constant 8 : i32
    %27 = arith.muli %26, %c8_i32 : i32
    %c8_i32_10 = arith.constant 8 : i32
    %28 = arith.addi %27, %c8_i32_10 : i32
    %c1_i32_11 = arith.constant 1 : i32
    %29 = arith.cmpi sle, %28, %c1_i32_11 : i32
    %30 = arith.extui %29 : i1 to i32
    %c0_i32_12 = arith.constant 0 : i32
    %31 = arith.cmpi ne, %30, %c0_i32_12 : i32
    scf.if %31 {
      %c0_14 = arith.constant 0 : index
      %c0_15 = arith.constant 0 : index
      %35 = vector.load %arg4[%c0_14, %c0_15] : memref<8x128xf32, #tpu.memory_space<vmem>>, vector<8x128xf32>
      %36 = vector.shape_cast %24 : vector<8x128xf32> to vector<1x8x128xf32>
      %cst_16 = arith.constant dense<0.000000e+00> : vector<8x128xf32>
      %37 = vector.multi_reduction <add>, %36, %cst_16 [0] : vector<1x8x128xf32> to vector<8x128xf32>
      %38 = arith.addf %35, %37 : vector<8x128xf32>
      %c0_17 = arith.constant 0 : index
      %c0_18 = arith.constant 0 : index
      %39 = vector.load %arg4[%c0_17, %c0_18] : memref<8x128xf32, #tpu.memory_space<vmem>>, vector<8x128xf32>
      tpu.vector_store %arg4[%c0_17, %c0_18], %38 {strides = array<i32>} : memref<8x128xf32, #tpu.memory_space<vmem>>, vector<8x128xf32>,
    } else {
    }
    %true = arith.constant true
    %32 = arith.xori %29, %true : i1
    %33 = arith.extui %32 : i1 to i32
    %c0_i32_13 = arith.constant 0 : i32
    %34 = arith.cmpi ne, %33, %c0_i32_13 : i32
    scf.if %34 {
      %35 = tpu.iota {dimensions = array<i32: 0>} : vector<8x1xi32>
      %36 = vector.broadcast %27 : i32 to vector<8x1xi32>
      %37 = arith.addi %35, %36 : vector<8x1xi32>
      %c1_i32_14 = arith.constant 1 : i32
      %38 = vector.broadcast %c1_i32_14 : i32 to vector<8x1xi32>
      %39 = arith.cmpi slt, %37, %38 : vector<8x1xi32>
      %cst_15 = arith.constant 0.000000e+00 : f32
      %40 = vector.shape_cast %39 : vector<8x1xi1> to vector<8x1xi1>
      %41 = vector.broadcast %40 : vector<8x1xi1> to vector<8x128xi1>
      %42 = vector.broadcast %cst_15 : f32 to vector<8x128xf32>
      %43 = arith.select %41, %24, %42 : vector<8x128xi1>, vector<8x128xf32>
      %c0_16 = arith.constant 0 : index
      %c0_17 = arith.constant 0 : index
      %44 = vector.load %arg4[%c0_16, %c0_17] : memref<8x128xf32, #tpu.memory_space<vmem>>, vector<8x128xf32>
      %45 = vector.shape_cast %43 : vector<8x128xf32> to vector<1x8x128xf32>
      %cst_18 = arith.constant dense<0.000000e+00> : vector<8x128xf32>
      %46 = vector.multi_reduction <add>, %45, %cst_18 [0] : vector<1x8x128xf32> to vector<8x128xf32>
      %47 = arith.addf %44, %46 : vector<8x128xf32>
      %c0_19 = arith.constant 0 : index
      %c0_20 = arith.constant 0 : index
      %48 = vector.load %arg4[%c0_19, %c0_20] : memref<8x128xf32, #tpu.memory_space<vmem>>, vector<8x128xf32>
      tpu.vector_store %arg4[%c0_19, %c0_20], %47 {strides = array<i32>} : memref<8x128xf32, #tpu.memory_space<vmem>>, vector<8x128xf32>,
    } else {
    }
    return
  }
  func.func @transform_0(%arg0: i32, %arg1: i32) -> (i32, i32) {
    %c1_i32 = arith.constant 1 : i32
    %0 = arith.muli %arg0, %c1_i32 : i32
    %1 = arith.addi %0, %arg1 : i32
    %c0_i32 = arith.constant 0 : i32
    %2 = arith.minsi %1, %c0_i32 : i32
    %c0_i32_0 = arith.constant 0 : i32
    %c0_i32_1 = arith.constant 0 : i32
    return %2, %c0_i32_0 : i32, i32
  }
  func.func @transform_1(%arg0: i32, %arg1: i32) -> (i32, i32) {
    %c1_i32 = arith.constant 1 : i32
    %0 = arith.muli %arg0, %c1_i32 : i32
    %1 = arith.addi %0, %arg1 : i32
    %c0_i32 = arith.constant 0 : i32
    %2 = arith.minsi %1, %c0_i32 : i32
    %c0_i32_0 = arith.constant 0 : i32
    %c0_i32_1 = arith.constant 0 : i32
    return %2, %c0_i32_0 : i32, i32
  }
  func.func @transform_2(%arg0: i32, %arg1: i32) -> (i32, i32) {
    %c0_i32 = arith.constant 0 : i32
    %c0_i32_0 = arith.constant 0 : i32
    return %arg0, %c0_i32 : i32, i32
  }
}

</mosaic_0001>

<bundles_post_ra>
// kernel: tpu_custom_call.1
= control target key start
LH: loop header
LB: loop body
LE: loop exit
PB: predicated region body
PF: predicated region fallthrough
CT: control target
= control target key end

     0   :  { %7 = vsyncpa [#allocation3], 0  ;;  %s826_s0 = inlined_call_operand.hbm [shape: f32[1,128], index: 0, kind: input, shape index: {}]   ;;  %s827_s1 = inlined_call_operand.vmem [shape: f32[1,128], index: 1, kind: input, shape index: {}]   ;;  %s828_s2 = inlined_call_operand.hbm [shape: f32[16,128], index: 2, kind: output, shape index: {}]  }
   0x1   :  { %9 = vsyncpa [#allocation3 + $0x1], 0 }
   0x2   :  { %10 = vsyncpa [#allocation4], 0 }
   0x3   :  { %12 = vsyncpa [#allocation4 + $0x1], 0  ;;  %s652_s9 = smov 0   ;;  %s654_s10 = smov 0  }
   0x4   :  { %s656_s11 = smov 0   ;;  %s658_s12 = smov 0  }
   0x5   :  { %s660_s13 = smov 0   ;;  %s662_s14 = smov 0  }
   0x6   :  { %s664_s15 = smov 0   ;;  %s666_s16 = smov 0  }
   0x7 LB: > { %s390_s17 = sadd.s32 4294967295, %s629_s16   ;;  %s391_s18 = sadd.s32 4294967294, %s629_s16   ;;  %s629_s16 = sphi %s666_s16, %s18_s16   ;;  %s625_s15 = sphi %s664_s15, %s838_s15   ;;  %s621_s14 = sphi %s662_s14, %s837_s14   ;;  %s617_s13 = sphi %s660_s13, %s816_s13   ;;  %s613_s12 = sphi %s658_s12, %s836_s12   ;;  %s609_s11 = sphi %s656_s11, %s835_s11   ;;  %s605_s10 = sphi %s654_s10, %s834_s10   ;;  %s601_s9 = sphi %s652_s9, %s833_s9  }
   0x8   : > { %s30_s19 = sadd.s32 1, %s625_s15  ;;  %p598_p1 = scmp.ne.s32.totalorder %s617_s13, 0 }
   0x9   : > { %p32_p0 = scmp.ge.s32.totalorder %s30_s19, 2  ;;  %p51_p2 = scmp.eq.s32.totalorder %s629_s16, 0 }
   0xa   : > { %p56_p3 = scmp.ne.s32.totalorder %s617_s13, %s613_s12  ;;  %p57_p5 = scmp.eq.s32.totalorder %s390_s17, 0 }
   0xb   : > { %s840_s19 = smov (%p32_p0, %s30_s19), 0  ;;  %p698_p4 = por %p598_p1, %p51_p2 }
   0xc   : > { %p702_p6 = por %p57_p5, %p56_p3  ;;  %s98_s22 = ssub.s32 %s625_s15, %s840_s19 }
   0xd   : > { %p99_p7 = scmp.eq.s32.totalorder %s98_s22, 0  ;;  %s101_s23 = sadd.s32 1, %s609_s11 }
   0xe   : > { %p111_p8 = scmp.ne.s32.totalorder %s609_s11, %s605_s10  ;;  %p112_p9 = scmp.eq.s32.totalorder %s390_s17, 1 }
   0xf   : > { %s710_s24 = scalar_select %p99_p7, %s609_s11, %s101_s23  }
  0x10   : > { %p117_p10 = scmp.ne.s32.totalorder %s605_s10, %s601_s9  ;;  %p118_p11 = scmp.eq.s32.totalorder %s391_s18, 1 }
  0x11   : > { %p716_p12 = por %p112_p9, %p111_p8  ;;  %p393_p0 = scmp.ge.s32.totalorder %s629_s16, 2 }
  0x12   : > { %p720_p13 = por %p118_p11, %p117_p10 }
  0x13   : > { %134 = sbr.rel (%p393_p0) target bundleno = 53 (0x35), region = 16 }
  0x1a   : > { %137 = sbr.rel (!%p698_p4) target bundleno = 53 (0x35), region = 20 }
  0x21   : > { %151 = vsyncadd [#allocation3], 112  ;;  %s631_s27 = smov [#allocation2]   ;;  %s496_s3 = scalar_lea.hbm %s826_s0, 16 }
  0x22   : > { %s155_s28 = sshll.u32 %s631_s27, 4  ;;  %p497_p1 = scmp.ne.s32.totalorder %s826_s0, %s496_s3  ;;  %s156_s28 = int_to_ptr.vmem [resolvable:$true] %s155_s28 }
  0x23   : > { %p502_p2 = scmp.lt.u32.totalorder %s496_s3, %s496_s3  ;;  %p504_p3 = scmp.lt.u32.totalorder %s496_s3, %s826_s0 }
  0x25   : > { %p505_p5 = por %p504_p3, %p502_p2 }
  0x27   : > { %p506_p7 = pnand %p505_p5, %p497_p1 }
  0x29   : > { %509 = shalt.err (!%p506_p7)
}
  0x2a   : > { %s510_s8 = scalar_lea.vmem %s156_s28, 16  ;;  %s516_s12 = scalar_lea.vmem %s156_s28, 256 }
  0x2b   : > { %p511_p4 = scmp.ne.s32.totalorder %s156_s28, %s510_s8  ;;  %p517_p8 = scmp.lt.s32.totalorder %s156_s28, %s156_s28 }
  0x2c   : > { %p518_p9 = scmp.lt.s32.totalorder %s516_s12, %s510_s8 }
  0x2e   : > { %p519_p10 = por %p518_p9, %p517_p8 }
  0x30   : > { %p520_p11 = pnand %p519_p10, %p511_p4 }
  0x32   : > { %523 = shalt.err (!%p520_p11)
}
  0x33   : > { %s632_s17 = smov 16   ;;  %s633_s18 = smov 1  }
  0x34   : > { %161 = dma.hbm_to_vmem [thread:$0]  %s826_s0, 16, %s156_s28, [#allocation3], %s632_s17, %s632_s17, %s633_s18  }
  0x35 PF: > { %p399_p1 = scmp.ge.s32.totalorder %s629_s16, 1  ;;  %p181_p2 = scmp.lt.s32.totalorder %s629_s16, 3 }
  0x37   : > { %p182_p3 = pnand %p399_p1, %p181_p2 }
  0x38   : > { %s187_s23 = sand.u32 (!%p182_p3), 1, %s617_s13  }
  0x39   : > { %185 = sbr.rel (%p182_p3) target bundleno = 121 (0x79), region = 28  ;;  %s400_s27 = sshll.u32 (!%p182_p3), %s187_s23, 3 }
  0x3a   : > { %s188_s29 = scalar_lea.sflag (!%p182_p3), [#allocation3], %s187_s23  ;;  %s191_s30 = scalar_lea.vmem (!%p182_p3), [#allocation2], %s400_s27 }
  0x40   : > { %589 = dma.done.wait (%p702_p6), %s188_s29, 128  }
  0x41   : > { %591 = vsyncadd (%p702_p6), %s188_s29, 4294967168  ;;  %p228_p5 = scmp.lt.s32.totalorder %s621_s14, 0  ;;  %v256_v0 = vlaneseq  ;;  %s218_s28 = sand.u32 1, %s605_s10   ;;  %v634_v2 = vmov 0.0   ;;  %v247_v3 = vld [vmem:[%s191_s30] sm:$0xff]  ;;  %v635_v11 = vmov 1.0  }
  0x42   : > { %s401_s3 = sshll.u32 %s218_s28, 3  ;;  %s404_s4 = sshll.u32 %s621_s14, 3 }
  0x43   : > { %s229_s5 = scalar_select %p228_p5, %s621_s14, 0  ;;  %v257_v1 = vand.u32 127, %v256_v0 }
  0x44   : > { %s756_s6 = sadd.s32 8, %s404_s4  ;;  %s758_s21 = scalar_lea.vmem [#allocation5], %s401_s3 }
  0x45   : > { %s402_s7 = sshll.u32 %s229_s5, 3  ;;  %246 = vst [vmem:[%s758_s21] sm:$0xff] %v634_v2  ;;  %v258_v4 = vand.u32 1, %v257_v1  ;;  %p405_p7 = scmp.gt.s32.totalorder %s756_s6, 1 }
  0x46   : > { %p233_p6 = scmp.lt.s32.totalorder %s402_s7, 0 }
  0x47   : > { %vm259_vm0 = vcmp.eq.s32.totalorder %v258_v4, 0 }
  0x48   : > { %s842_s7 = smov (!%p233_p6, %s402_s7), 0  ;;  %v260_v12 = vsel %vm259_vm0, 2.0, %v635_v11 }
  0x49   : > { %s235_s17 = scalar_lea.vmem %s827_s1, %s842_s7 }
  0x4a   : > { %v248_v5 = vld [vmem:[%s235_s17] sm:$0xff] }
  0x4b   : > { %v249_v6 = vsub.f32 %v247_v3, %v248_v5 }
  0x4c   : > { %268 = sbr.rel (%p405_p7) target bundleno = 87 (0x57), region = 40  ;;  %v269_v15 = vld [vmem:[%s758_s21] sm:$0xff] (!%p405_p7) }
  0x4d   : > { %v250_v7 = vand.u32 2147483647, %v249_v6  ;;  %v252_v8 = vmul.f32 0.5, %v249_v6 }
  0x4f   : > { %vm251_vm1 = vcmp.lt.f32.partialorder %v250_v7, 1.0  ;;  %v253_v9 = vmul.f32 %v252_v8, %v249_v6  ;;  %v403_v10 = vadd.f32 -0.5, %v250_v7 }
  0x51   : > { %v255_v13 = vsel %vm251_vm1, %v253_v9, %v403_v10 }
  0x52   : > { %v261_v14 = vmul.f32 %v260_v12, %v255_v13 }
  0x54   : > { %v271_v16 = vadd.f32 %v269_v15, %v261_v14 }
  0x56   : > { %272 = vst [vmem:[%s758_s21] sm:$0xff] %v271_v16 }
  0x57 PF: > { %p406_p4 = scmp.le.s32.totalorder %s756_s6, 1 }
  0x58   : > { %v278_v17 = vshrl.u32 (!%p406_p4), %v256_v0, 7  ;;  %v279_v18 = vstv (!%p406_p4), %s404_s4 }
  0x59   : > { %276 = sbr.rel (%p406_p4) target bundleno = 97 (0x61), region = 44 }
  0x5a   : > { %v280_v19 = vadd.s32 (!%p406_p4), %v279_v18, %v278_v17 }
  0x5c   : > { %vm281_vm2 = vcmp.lt.s32.totalorder (!%p406_p4), %v280_v19, 1 }
  0x5d   : > { %v285_v20 = vld [vmem:[%s758_s21] sm:$0xff] (!%p406_p4)  ;;  %v284_v21 = vsel (!%p406_p4), %vm281_vm2, %v261_v14, 0.0 }
  0x5e   : > { %v287_v22 = vadd.f32 (!%p406_p4), %v285_v20, %v284_v21 }
  0x60   : > { %288 = vst [vmem:[%s758_s21] sm:$0xff] %v287_v22 }
  0x61 PF: > { %s408_s18 = sshll.u32 %s621_s14, 7  ;;  %s303_s27 = sshll.u32 %s758_s21, 4  ;;  %s304_s27 = int_to_ptr.vmem [resolvable:$true] %s303_s27 }
  0x62   : > { %s776_s23 = scalar_lea.hbm %s828_s2, %s408_s18  ;;  %s290_s29 = scalar_lea.sflag [#allocation4], %s218_s28 }
  0x63   : > { %s524_s30 = scalar_lea.vmem %s304_s27, 128  ;;  %s636_s3 = smov [#allocation5]  }
  0x64   : > { %p525_p8 = scmp.ne.s32.totalorder %s304_s27, %s524_s30  ;;  %s528_s4 = sshll.u32 %s636_s3, 4  ;;  %s529_s4 = int_to_ptr.vmem [resolvable:$false] %s528_s4 }
  0x65   : > { %s530_s5 = scalar_lea.vmem %s529_s4, 256  ;;  %p531_p11 = scmp.lt.s32.totalorder %s304_s27, %s529_s4 }
  0x66   : > { %p526_p9 = pnand %p525_p8, %p716_p12  ;;  %p532_p1 = scmp.lt.s32.totalorder %s530_s5, %s524_s30 }
  0x68   : > { %p527_p10 = pneg %p526_p9  ;;  %p533_p2 = por %p532_p1, %p531_p11 }
  0x6a   : > { %p534_p3 = pnand %p533_p2, %p527_p10 }
  0x6c   : > { %537 = shalt.err (!%p534_p3)
}
  0x6d   : > { %s538_s14 = scalar_lea.hbm %s776_s23, 128  ;;  %s542_s7 = scalar_lea.hbm %s828_s2, 256 }
  0x6e   : > { %p539_p5 = scmp.ne.s32.totalorder %s776_s23, %s538_s14  ;;  %p543_p4 = scmp.lt.u32.totalorder %s776_s23, %s828_s2 }
  0x6f   : > { %p544_p8 = scmp.lt.u32.totalorder %s542_s7, %s538_s14  ;;  %p546_p10 = scmp.lt.u32.totalorder %s538_s14, %s776_s23 }
  0x70   : > { %p540_p6 = pnand %p539_p5, %p716_p12 }
  0x71   : > { %p545_p9 = por %p544_p8, %p543_p4 }
  0x72   : > { %p541_p7 = pneg %p540_p6 }
  0x73   : > { %p547_p11 = por %p546_p10, %p545_p9 }
  0x75   : > { %p548_p1 = pnand %p547_p11, %p541_p7 }
  0x77   : > { %551 = shalt.err (!%p548_p1)
}
  0x78   : > { %413 = dma.vmem_to_hbm [thread:$0]  (%p716_p12), %s304_s27, 128, %s776_s23, %s290_s29  }
  0x79 PF: > { %s315_s12 = sand.u32 1, %s601_s9   ;;  %p416_p2 = pnand %p393_p0, %p720_p13 }
  0x7a   : > { %s316_s17 = scalar_lea.sflag [#allocation4], %s315_s12 }
  0x7b   : > { %593 = dma.done.wait (!%p416_p2), %s316_s17, 128  }
  0x7c   : > { %595 = vsyncadd (!%p416_p2), %s316_s17, 4294967168  ;;  %s18_s16 = sadd.s32 1, %s629_s16   ;;  %s833_s9 = smov %s605_s10 }
  0x7d   : > { %p15_p3 = scmp.ge.s32.totalorder %s18_s16, 4   ;;  %s834_s10 = smov %s609_s11 }
  0x7e   : > { %s835_s11 = smov %s710_s24  ;;  %s836_s12 = smov %s617_s13 }
  0x7f   : > { %s816_s13 = smov 0   ;;  %s837_s14 = smov %s625_s15 }
  0x80   : > { %s838_s15 = smov %s840_s19  ;;  %17 = sbr.rel (!%p15_p3) target bundleno = 7 (0x7), region = 88 }
  0x87   :  { %321 = vsyncpa [#allocation3], 1 }
  0x88   :  { %323 = vsyncpa [#allocation3 + $0x1], 1 }
  0x89   :  { %324 = vsyncpa [#allocation4], 1 }
  0x8a   :  { %326 = vsyncpa [#allocation4 + $0x1], 1 }

</bundles_post_ra>
